<compile_context>
chip_gen: v7x
topology: tpu7x:2x2x1
jax: 0.10.0
libtpu: 0.0.40
codegen_flags: <defaults>
</compile_context>

<pallas_src>
import math

import jax
import jax.numpy as jnp
from jax.experimental import pallas as pl
from jax.experimental.pallas import tpu as pltpu

LANE = 128
MAX_TILE_SUB = 32              # 32 sublanes x 128 lanes = 4096 samples per grid step
TWO_PI = 2.0 * math.pi


def _so2_kernel(u_ref, out_ref):
    # u_ref:   (1, 1, S, 128)  uniforms in [0, 1)
    # out_ref: (1, 4, S, 128)  rows = [cos, -sin, sin, cos]
    theta = u_ref[0, 0] * TWO_PI          # full (S, 128) vreg tiles
    c = jnp.cos(theta)
    s = jnp.sin(theta)
    out_ref[0, 0] = c
    out_ref[0, 1] = -s
    out_ref[0, 2] = s
    out_ref[0, 3] = c


def _so3_kernel(u_ref, out_ref):
    # u_ref:   (1, 3, S, 128)  uniforms in [0, 1)
    # out_ref: (1, 9, S, 128)  flattened 3x3 rotation matrices
    #
    # Shoemake's construction of a uniform unit quaternion: identical
    # distribution to the PyTorch module's normalized-Gaussian quaternion,
    # but with no log / rsqrt and only 3 uniforms per sample.
    u1 = u_ref[0, 0]
    a2 = u_ref[0, 1] * TWO_PI
    a3 = u_ref[0, 2] * TWO_PI
    r1 = jnp.sqrt(jnp.maximum(1.0 - u1, 0.0))
    r2 = jnp.sqrt(u1)
    q0 = r1 * jnp.sin(a2)
    q1 = r1 * jnp.cos(a2)
    q2 = r2 * jnp.sin(a3)
    q3 = r2 * jnp.cos(a3)
    out_ref[0, 0] = 1.0 - 2.0 * (q2 * q2 + q3 * q3)
    out_ref[0, 1] = 2.0 * (q1 * q2 - q0 * q3)
    out_ref[0, 2] = 2.0 * (q1 * q3 + q0 * q2)
    out_ref[0, 3] = 2.0 * (q1 * q2 + q0 * q3)
    out_ref[0, 4] = 1.0 - 2.0 * (q1 * q1 + q3 * q3)
    out_ref[0, 5] = 2.0 * (q2 * q3 - q0 * q1)
    out_ref[0, 6] = 2.0 * (q1 * q3 - q0 * q2)
    out_ref[0, 7] = 2.0 * (q2 * q3 + q0 * q1)
    out_ref[0, 8] = 1.0 - 2.0 * (q1 * q1 + q2 * q2)


def random_sod(d, n=None, key=None):
    """Pallas equivalent of RandomSOd(d).forward(n). Returns [n, d, d] (or [d, d])."""
    assert d in (2, 3), "d must be 2 or 3."
    if key is None:
        key = jax.random.PRNGKey(0)
    n_eff = n if n else 1
    n_rand = 1 if d == 2 else 3
    rows = d * d

    # Samples tiled as (tile, sublane, lane); tile_sub is a multiple of 8.
    sub_needed = pl.cdiv(n_eff, LANE)
    tile_sub = min(MAX_TILE_SUB, ((sub_needed + 7) // 8) * 8)
    num_tiles = pl.cdiv(sub_needed, tile_sub)

    u = jax.random.uniform(
        key, (num_tiles, n_rand, tile_sub, LANE), dtype=jnp.float32)

    kernel = _so2_kernel if d == 2 else _so3_kernel
    out = pl.pallas_call(
        kernel,
        out_shape=jax.ShapeDtypeStruct(
            (num_tiles, rows, tile_sub, LANE), jnp.float32),
        grid=(num_tiles,),
        in_specs=[pl.BlockSpec((1, n_rand, tile_sub, LANE),
                               lambda i: (i, 0, 0, 0))],
        out_specs=pl.BlockSpec((1, rows, tile_sub, LANE),
                               lambda i: (i, 0, 0, 0)),
        compiler_params=pltpu.CompilerParams(
            dimension_semantics=("parallel",)),
    )(u)

    # Kernel output is lane-major (matrix-entry planes of samples); relayout to
    # the PyTorch [n, d, d] layout in the wrapper.
    # TODO(synk): consumers that can read the (d*d, n) lane-major layout
    # directly would skip this extra relayout pass for very large n.
    mats = out.transpose(0, 2, 3, 1).reshape(num_tiles * tile_sub * LANE, d, d)
    mats = mats[:n_eff]
    return mats if n else mats[0]


def _det(R):
    d = R.shape[-1]
    if d == 2:
        return R[..., 0, 0] * R[..., 1, 1] - R[..., 0, 1] * R[..., 1, 0]
    c = jnp.cross(R[..., 1, :], R[..., 2, :])
    return jnp.sum(R[..., 0, :] * c, axis=-1)


if __name__ == "__main__":
    key = jax.random.PRNGKey(0)
    k2, k3, k1 = jax.random.split(key, 3)

    n = 8
    R2 = jax.block_until_ready(random_sod(2, n=n, key=k2))       # [8, 2, 2]
    R3 = jax.block_until_ready(random_sod(3, n=n, key=k3))       # [8, 3, 3]
    R2_single = jax.block_until_ready(random_sod(2, key=k1))     # [2, 2]

    # sanity: proper rotations (R R^T = I, det = +1)
    def _check(R, d):
        assert R.shape == (n, d, d) and R.dtype == jnp.float32
        eye = jnp.eye(d, dtype=jnp.float32)
        rrt = jnp.einsum("nij,nkj->nik", R, R)
        assert float(jnp.max(jnp.abs(rrt - eye))) < 1e-4
        assert float(jnp.max(jnp.abs(_det(R) - 1.0))) < 1e-4

    _check(R2, 2)
    _check(R3, 3)
    assert R2_single.shape == (2, 2) and R2_single.dtype == jnp.float32
    assert float(jnp.max(jnp.abs(R2_single @ R2_single.T - jnp.eye(2)))) < 1e-4

    print("KERNEL_OK")
</pallas_src>

<mosaic_0001>
module attributes {stable_mosaic.version = 11 : i64} {
  func.func @_so2_kernel(%arg0: i32, %arg1: memref<1x1x8x128xf32, #tpu.memory_space<vmem>>, %arg2: memref<1x4x8x128xf32, #tpu.memory_space<vmem>>) attributes {dimension_semantics = [#tpu.dimension_semantics<parallel>], iteration_bounds = array<i64: 1>, scalar_prefetch = 0 : i64, scratch_operands = 0 : i64, tpu.core_type = #tpu.core_type<tc>, window_params = [{transform_indices = @transform_0, window_bounds = array<i64: 1, 1, 8, 128>}, {transform_indices = @transform_1, window_bounds = array<i64: 1, 4, 8, 128>}]} {
    %c0 = arith.constant 0 : index
    %c0_0 = arith.constant 0 : index
    %c0_1 = arith.constant 0 : index
    %c0_2 = arith.constant 0 : index
    %0 = vector.load %arg1[%c0, %c0_0, %c0_1, %c0_2] : memref<1x1x8x128xf32, #tpu.memory_space<vmem>>, vector<1x1x8x128xf32>
    %1 = vector.shape_cast %0 : vector<1x1x8x128xf32> to vector<8x128xf32>
    %cst = arith.constant 6.28318548 : f32
    %2 = vector.broadcast %cst : f32 to vector<8x128xf32>
    %3 = arith.mulf %1, %2 : vector<8x128xf32>
    %4 = math.cos %3 : vector<8x128xf32>
    %5 = math.sin %3 : vector<8x128xf32>
    %c0_3 = arith.constant 0 : index
    %c0_4 = arith.constant 0 : index
    %c0_5 = arith.constant 0 : index
    %c0_6 = arith.constant 0 : index
    %6 = vector.load %arg2[%c0_3, %c0_4, %c0_5, %c0_6] : memref<1x4x8x128xf32, #tpu.memory_space<vmem>>, vector<1x1x8x128xf32>
    %7 = vector.shape_cast %6 : vector<1x1x8x128xf32> to vector<8x128xf32>
    %8 = vector.shape_cast %4 : vector<8x128xf32> to vector<1x1x8x128xf32>
    tpu.vector_store %arg2[%c0_3, %c0_4, %c0_5, %c0_6], %8 {strides = array<i32>} : memref<1x4x8x128xf32, #tpu.memory_space<vmem>>, vector<1x1x8x128xf32>,
    %cst_7 = arith.constant 0.000000e+00 : f32
    %9 = vector.broadcast %cst_7 : f32 to vector<8x128xf32>
    %10 = arith.subf %9, %5 : vector<8x128xf32>
    %c0_8 = arith.constant 0 : index
    %c1 = arith.constant 1 : index
    %c0_9 = arith.constant 0 : index
    %c0_10 = arith.constant 0 : index
    %11 = vector.load %arg2[%c0_8, %c1, %c0_9, %c0_10] : memref<1x4x8x128xf32, #tpu.memory_space<vmem>>, vector<1x1x8x128xf32>
    %12 = vector.shape_cast %11 : vector<1x1x8x128xf32> to vector<8x128xf32>
    %13 = vector.shape_cast %10 : vector<8x128xf32> to vector<1x1x8x128xf32>
    tpu.vector_store %arg2[%c0_8, %c1, %c0_9, %c0_10], %13 {strides = array<i32>} : memref<1x4x8x128xf32, #tpu.memory_space<vmem>>, vector<1x1x8x128xf32>,
    %c0_11 = arith.constant 0 : index
    %c2 = arith.constant 2 : index
    %c0_12 = arith.constant 0 : index
    %c0_13 = arith.constant 0 : index
    %14 = vector.load %arg2[%c0_11, %c2, %c0_12, %c0_13] : memref<1x4x8x128xf32, #tpu.memory_space<vmem>>, vector<1x1x8x128xf32>
    %15 = vector.shape_cast %14 : vector<1x1x8x128xf32> to vector<8x128xf32>
    %16 = vector.shape_cast %5 : vector<8x128xf32> to vector<1x1x8x128xf32>
    tpu.vector_store %arg2[%c0_11, %c2, %c0_12, %c0_13], %16 {strides = array<i32>} : memref<1x4x8x128xf32, #tpu.memory_space<vmem>>, vector<1x1x8x128xf32>,
    %c0_14 = arith.constant 0 : index
    %c3 = arith.constant 3 : index
    %c0_15 = arith.constant 0 : index
    %c0_16 = arith.constant 0 : index
    %17 = vector.load %arg2[%c0_14, %c3, %c0_15, %c0_16] : memref<1x4x8x128xf32, #tpu.memory_space<vmem>>, vector<1x1x8x128xf32>
    %18 = vector.shape_cast %17 : vector<1x1x8x128xf32> to vector<8x128xf32>
    %19 = vector.shape_cast %4 : vector<8x128xf32> to vector<1x1x8x128xf32>
    tpu.vector_store %arg2[%c0_14, %c3, %c0_15, %c0_16], %19 {strides = array<i32>} : memref<1x4x8x128xf32, #tpu.memory_space<vmem>>, vector<1x1x8x128xf32>,
    return
  }
  func.func @transform_0(%arg0: i32) -> (i32, i32, i32, i32) {
    %c0_i32 = arith.constant 0 : i32
    %c0_i32_0 = arith.constant 0 : i32
    %c0_i32_1 = arith.constant 0 : i32
    %c0_i32_2 = arith.constant 0 : i32
    return %arg0, %c0_i32, %c0_i32_0, %c0_i32_1 : i32, i32, i32, i32
  }
  func.func @transform_1(%arg0: i32) -> (i32, i32, i32, i32) {
    %c0_i32 = arith.constant 0 : i32
    %c0_i32_0 = arith.constant 0 : i32
    %c0_i32_1 = arith.constant 0 : i32
    %c0_i32_2 = arith.constant 0 : i32
    return %arg0, %c0_i32, %c0_i32_0, %c0_i32_1 : i32, i32, i32, i32
  }
}

</mosaic_0001>

<bundles_post_ra>
// kernel: tpu_custom_call.1
= control target key start
LH: loop header
LB: loop body
LE: loop exit
PB: predicated region body
PF: predicated region fallthrough
CT: control target
= control target key end

     0   :  { %6 = vsyncpa [#allocation3], 0  ;;  %s394_s0 = inlined_call_operand.hbm [shape: f32[1,1,8,128], index: 0, kind: input, shape index: {}]   ;;  %s395_s1 = inlined_call_operand.hbm [shape: f32[1,4,8,128], index: 1, kind: output, shape index: {}]  }
   0x1   :  { %7 = vsyncpa [#allocation4], 0  ;;  %s329_s6 = smov [#allocation2]   ;;  %s281_s10 = scalar_lea.hbm %s394_s0, 128 }
   0x2   :  { %s14_s7 = sshll.u32 %s329_s6, 4  ;;  %p282_p0 = scmp.ne.s32.totalorder %s394_s0, %s281_s10  ;;  %s15_s7 = int_to_ptr.vmem [resolvable:$true] %s14_s7 }
   0x3   :  { %p285_p1 = scmp.lt.u32.totalorder %s281_s10, %s394_s0 }
   0x5   :  { %p287_p2 = pnand %p285_p1, %p282_p0 }
   0x7   :  { %290 = shalt.err (!%p287_p2)
}
   0x8   :  { %s291_s15 = scalar_lea.vmem %s15_s7, 128  ;;  %p296_p4 = scmp.lt.s32.totalorder %s15_s7, %s15_s7 }
   0x9   :  { %p292_p3 = scmp.ne.s32.totalorder %s15_s7, %s291_s15  ;;  %p297_p5 = scmp.lt.s32.totalorder %s291_s15, %s291_s15 }
   0xb   :  { %p298_p6 = por %p297_p5, %p296_p4 }
   0xd   :  { %p299_p7 = pnand %p298_p6, %p292_p3 }
   0xf   :  { %302 = shalt.err (!%p299_p7)
}
  0x10   :  { %17 = dma.hbm_to_vmem [thread:$0]  %s394_s0, 128, %s15_s7, [#allocation3]  }
  0x11   :  { %325 = dma.done.wait [#allocation3], 128  }
  0x12   :  { %326 = vsyncadd [#allocation3], 4294967168  ;;  %v21_v0 = vld [vmem:[#allocation2] sm:$0xff]  ;;  %v330_v13 = vmov 683565275   ;;  %s336_s0 = smov [#allocation5]  }
  0x13   :  { %v361_v1 = vmul.f32 6.2831855, %v21_v0  ;;  %v331_v15 = vmov 2475754826   ;;  %v332_v17 = vmov 2131351028  }
  0x14   :  { %v333_v19 = vmov 2102212464   ;;  %v334_v21 = vmov 920167782   ;;  %v335_v28 = vmov 1326507024  }
  0x15   :  { %v26_v2 = vand.u32 2139095040, %v361_v1  ;;  %v23_v4 = vand.u32 2147483647, %v361_v1  ;;  %vm25_vm7 = vcmp.lt.s32.totalorder %v361_v1, 0  ;;  %vm115_vm15 = vweird.f32 %v361_v1  ;;  %s243_s18 = sshll.u32 %s336_s0, 4  ;;  %s244_s18 = int_to_ptr.vmem [resolvable:$true] %s243_s18 }
  0x16   :  { %s303_s19 = scalar_lea.vmem %s244_s18, 512  ;;  %p308_p9 = scmp.lt.s32.totalorder %s244_s18, %s244_s18 }
  0x17   :  { %v27_v3 = vshrl.u32 %v26_v2, 23  ;;  %v30_v7 = vand.u32 8388607, %v23_v4  ;;  %vm24_vm8 = vcmp.le.f32.partialorder %v23_v4, 0.7853982  ;;  %p304_p8 = scmp.ne.s32.totalorder %s244_s18, %s303_s19  ;;  %p309_p10 = scmp.lt.s32.totalorder %s303_s19, %s303_s19 }
  0x19   :  { %v255_v5 = vadd.s32 4294967169, %v27_v3  ;;  %v31_v10 = vor.u32 8388608, %v30_v7  ;;  %p310_p11 = por %p309_p10, %p308_p9 }
  0x1b   :  { %v33_v6 = vadd.s32 1, %v255_v5  ;;  %v71_v30 = vshll.u32 %v31_v10, 8  ;;  %p311_p12 = pnand %p310_p11, %p304_p8 }
  0x1d   :  { %vm34_vm0 = vcmp.gt.s32.totalorder %v33_v6, 0 }
  0x1e   :  { %v35_v8 = vsel %vm34_vm0, %v33_v6, 0 }
  0x1f   :  { %v37_v9 = vand.u32 31, %v35_v8  ;;  %v36_v11 = vshrl.u32 %v35_v8, 5 }
  0x21   :  { %v38_v12 = vsub.s32 32, %v37_v9  ;;  %v40_v14 = vshll.u32 %v330_v13, %v37_v9  ;;  %v43_v16 = vshll.u32 %v331_v15, %v37_v9  ;;  %v46_v18 = vshll.u32 %v332_v17, %v37_v9 }
  0x22   :  { %v49_v20 = vshll.u32 %v333_v19, %v37_v9  ;;  %v52_v22 = vshll.u32 %v334_v21, %v37_v9  ;;  %vm55_vm1 = vcmp.lt.s32.totalorder %v36_v11, 1  ;;  %vm58_vm2 = vcmp.lt.s32.totalorder %v36_v11, 4 }
  0x23   :  { %v39_v23 = vshrl.u32 %v330_v13, %v38_v12  ;;  %v41_v24 = vshrl.u32 %v331_v15, %v38_v12  ;;  %v44_v25 = vshrl.u32 %v332_v17, %v38_v12  ;;  %v47_v26 = vshrl.u32 %v333_v19, %v38_v12 }
  0x24   :  { %v50_v27 = vshrl.u32 %v334_v21, %v38_v12  ;;  %v53_v29 = vshrl.u32 %v335_v28, %v38_v12  ;;  %vm56_vm3 = vcmp.lt.s32.totalorder %v36_v11, 2  ;;  %vm57_vm4 = vcmp.lt.s32.totalorder %v36_v11, 3 }
  0x25   :  { %v42_v31 = vor.u32 %v41_v24, %v40_v14  ;;  %v45_v32 = vor.u32 %v44_v25, %v43_v16  ;;  %v48_v33 = vor.u32 %v47_v26, %v46_v18 }
  0x26   :  { %v51_v34 = vor.u32 %v50_v27, %v49_v20  ;;  %v54_v35 = vor.u32 %v53_v29, %v52_v22 }
  0x27   :  { %v59_v36 = vsel %vm55_vm1, %v39_v23, %v42_v31  ;;  %v60_v37 = vsel %vm58_vm2, %v48_v33, 2102212464  ;;  %v63_v38 = vsel %vm55_vm1, %v42_v31, %v45_v32  ;;  %v67_v39 = vsel %vm55_vm1, %v45_v32, %v48_v33 }
  0x28   :  { %v61_v40 = vsel %vm57_vm4, %v45_v32, %v60_v37  ;;  %v64_v41 = vsel %vm58_vm2, %v51_v34, 920167782  ;;  %v68_v42 = vsel %vm58_vm2, %v54_v35, 1326507024 }
  0x29   :  { %v65_v43 = vsel %vm57_vm4, %v48_v33, %v64_v41  ;;  %v69_v44 = vsel %vm57_vm4, %v51_v34, %v68_v42  ;;  %v62_v45 = vsel %vm56_vm3, %v59_v36, %v61_v40 }
  0x2a   :  { %v66_v46 = vsel %vm56_vm3, %v63_v38, %v65_v43  ;;  %v70_v47 = vsel %vm56_vm3, %v67_v39, %v69_v44  ;;  %v78_v52 = vmul.u32 %v71_v30, %v62_v45 }
  0x2b   :  { %v367_v48 = vmul.u32.u64.low %v71_v30, %v70_v47  ;;  %v368_v49 = vmul.u32.u64.high %v71_v30, %v70_v47, %v367_v48  ;;  %v370_v50 = vmul.u32.u64.low %v71_v30, %v66_v46  ;;  %v371_v51 = vmul.u32.u64.high %v71_v30, %v66_v46, %v370_v50 }
  0x2d   :  { %vm80_vm5 = vc.u32 %v368_v49, %v370_v50  ;;  %v81_v53 = vadd.s32 1, %v371_v51  ;;  %v79_v0 = vadd.s32 %v370_v50, %v368_v49 }
  0x2f   :  { %v82_v54 = vsel %vm80_vm5, %v81_v53, %v371_v51 }
  0x30   :  { %v83_v55 = vadd.s32 %v82_v54, %v78_v52 }
  0x32   :  { %v84_v56 = vadd.s32 536870912, %v83_v55 }
  0x34   :  { %v85_v57 = vshrl.u32 %v84_v56, 30 }
  0x36   :  { %v86_v58 = vshll.u32 %v85_v57, 30  ;;  %v109_v14 = vsub.s32 4, %v85_v57 }
  0x38   :  { %v87_v59 = vsub.s32 %v83_v55, %v86_v58  ;;  %v110_v17 = vsel %vm25_vm7, %v109_v14, %v85_v57 }
  0x39   :  { %v112_v20 = vsel %vm24_vm8, 0, %v110_v17 }
  0x3a   :  { %v89_v60 = vsub.s32 0, %v87_v59  ;;  %v219_v21 = vadd.s32 3, %v112_v20  ;;  %v116_v22 = vand.u32 3, %v112_v20 }
  0x3c   :  { %v256_v61 = vmin.u32 %v89_v60, %v87_v59  ;;  %v220_v23 = vand.u32 3, %v219_v21  ;;  %vm121_vm9 = vcmp.eq.s32.totalorder %v116_v22, 2  ;;  %vm118_vm11 = vcmp.eq.s32.totalorder %v116_v22, 0 }
  0x3d   :  { %vm117_vm13 = vcmp.lt.s32.totalorder %v116_v22, 2 }
  0x3e   :  { %v91_v62 = vclz %v256_v61  ;;  %vm225_vm10 = vcmp.eq.s32.totalorder %v220_v23, 2  ;;  %vm222_vm12 = vcmp.eq.s32.totalorder %v220_v23, 0  ;;  %vm221_vm14 = vcmp.lt.s32.totalorder %v220_v23, 2 }
  0x40   :  { %v257_v63 = vadd.s32 4294967294, %v91_v62 }
  0x42   :  { %vm258_vm6 = vcmp.lt.s32.totalorder %v257_v63, 0 }
  0x43   :  { %v94_v2 = vsel %vm258_vm6, 0, %v257_v63 }
  0x44   :  { %v95_v3 = vsub.s32 32, %v94_v2  ;;  %v96_v5 = vshll.u32 %v87_v59, %v94_v2  ;;  %v99_v6 = vsub.s32 4294967266, %v94_v2 }
  0x46   :  { %v97_v7 = vshrl.u32 %v79_v0, %v95_v3  ;;  %v100_v8 = vadd.s32 127, %v99_v6 }
  0x48   :  { %v98_v9 = vor.u32 %v97_v7, %v96_v5  ;;  %v101_v10 = vshll.u32 %v100_v8, 23 }
  0x4a   :  { %v102_v11 = vor.u32 4788187, %v101_v10  ;;  %v105_v12 = vcvt.s32.f32 %v98_v9 }
  0x4c   :  { %v103_v13 = vand.u32 2147483647, %v102_v11 }
  0x4e   :  { %v106_v15 = vmul.f32 %v105_v12, %v103_v13 }
  0x50   :  { %v107_v16 = vxor.u32 2147483648, %v106_v15 }
  0x52   :  { %v108_v18 = vsel %vm25_vm7, %v107_v16, %v106_v15 }
  0x53   :  { %v111_v19 = vsel %vm24_vm8, %v361_v1, %v108_v18 }
  0x54   :  { %277 = vcosq.f32 %v111_v19 }
  0x55   :  { %279 = vsinq.f32 %v111_v19 }
  0x5e   :  { %v278_v24 = vpop.eup %277 }
  0x5f   :  { %v280_v25 = vpop.eup %279  ;;  %v122_v26 = vxor.u32 2147483648, %v278_v24 }
  0x60   :  { %v119_v4 = vxor.u32 2147483648, %v280_v25 }
  0x61   :  { %v123_v27 = vsel %vm121_vm9, %v122_v26, %v280_v25  ;;  %v227_v28 = vsel %vm225_vm10, %v122_v26, %v280_v25 }
  0x62   :  { %v120_v29 = vsel %vm118_vm11, %v278_v24, %v119_v4  ;;  %v224_v30 = vsel %vm222_vm12, %v278_v24, %v119_v4 }
  0x63   :  { %v124_v31 = vsel %vm117_vm13, %v120_v29, %v123_v27  ;;  %v228_v32 = vsel %vm221_vm14, %v224_v30, %v227_v28 }
  0x64   :  { %v125_v33 = vsel %vm115_vm15, nan, %v124_v31  ;;  %v229_v34 = vsel %vm115_vm15, nan, %v228_v32 }
  0x65   :  { %230 = vst [vmem:[#allocation5] sm:$0xff] %v125_v33  ;;  %237 = vst [vmem:[#allocation5 + $0x18] sm:$0xff] %v125_v33  ;;  %v231_v35 = vsub.f32 0.0, %v229_v34 }
  0x66   :  { %235 = vst [vmem:[#allocation5 + $0x10] sm:$0xff] %v229_v34 }
  0x67   :  { %233 = vst [vmem:[#allocation5 + $0x8] sm:$0xff] %v231_v35 }
  0x68   :  { %314 = shalt.err (!%p311_p12)
}
  0x69   :  { %s315_s22 = scalar_lea.hbm %s395_s1, 512 }
  0x6a   :  { %p316_p13 = scmp.ne.s32.totalorder %s395_s1, %s315_s22  ;;  %p319_p0 = scmp.lt.u32.totalorder %s315_s22, %s395_s1 }
  0x6c   :  { %p321_p1 = pnand %p319_p0, %p316_p13 }
  0x6e   :  { %324 = shalt.err (!%p321_p1)
}
  0x6f   :  { %s337_s27 = smov 128   ;;  %s338_s28 = smov 8  }
  0x70   :  { %249 = dma.vmem_to_hbm [thread:$0]  %s244_s18, 512, %s395_s1, [#allocation4], %s337_s27, %s337_s27, %s338_s28  }
  0x71   :  { %327 = dma.done.wait [#allocation4], 512  }
  0x72   :  { %328 = vsyncadd [#allocation4], 4294966784 }
  0x73   :  { %253 = vsyncpa [#allocation3], 1 }
  0x74   :  { %254 = vsyncpa [#allocation4], 1 }

</bundles_post_ra>
